<compile_context>
chip_gen: v7x
topology: tpu7x:2x2x1
jax: 0.10.0
libtpu: 0.0.40
codegen_flags: <defaults>
</compile_context>

<pallas_src>
import jax
import jax.numpy as jnp
from jax.experimental import pallas as pl
from jax.experimental.pallas import tpu as pltpu


def _frozen_bn_kernel(x_ref, scale_ref, shift_ref, o_ref):
    # x_ref/o_ref        : (Tr, Thw) tile of the (N*C, H*W) flattened activation
    # scale_ref/shift_ref: (Tr, 1) float32 per-row (= per batch*channel) affine
    x = x_ref[...].astype(jnp.float32)
    y = x * scale_ref[...] + shift_ref[...]
    o_ref[...] = y.astype(o_ref.dtype)


def _choose_tiles(r, hw, itemsize, target_bytes=4 << 20):
    """Pick (tr, thw) tiles for the (r, hw) array; last dim kept lane-dense."""
    sub = max(8, 32 // itemsize)              # sublane multiple for this dtype
    # Lane-dim tile: full H*W if it fits the budget (or is too small to tile),
    # otherwise a multiple of 128.
    if hw < 128 or hw * itemsize * sub <= target_bytes:
        thw = hw
    else:
        thw = max(128, (target_bytes // (sub * itemsize)) // 128 * 128)
        thw = min(thw, (hw // 128) * 128)
    # Row-dim tile: multiple of `sub`, fills the remaining byte budget.
    if r < sub:
        tr = r                                # full (small) row extent
    else:
        tr = max(sub, (target_bytes // max(thw * itemsize, 1)) // sub * sub)
        tr = min(tr, (r // sub) * sub)
    # Guarantee >=2 grid steps only when the tensor is big enough that the
    # ~0.35us extra step is noise (v7x has 2 TCs; v5e/v6e keep the single
    # full-size step for small tensors).
    total_bytes = r * hw * itemsize
    steps = pl.cdiv(r, tr) * pl.cdiv(hw, thw)
    if steps < 2 and total_bytes >= (2 << 20) and tr > sub:
        tr = max(sub, (tr // 2) // sub * sub)
    return tr, thw


def frozen_batch_norm_2d(x, weight, bias, running_mean, running_var, *,
                         eps=1e-5, donate_input=False):
    """x: (N, C, H, W); weight/bias/running_mean/running_var: (C,)."""
    n, c, h, w = x.shape
    hw = h * w
    r = n * c
    dtype = x.dtype
    itemsize = jnp.dtype(dtype).itemsize

    # Per-channel affine precompute in float32 (same arithmetic as PyTorch).
    scale = weight.astype(jnp.float32) * jax.lax.rsqrt(
        running_var.astype(jnp.float32) + eps)
    shift = bias.astype(jnp.float32) - running_mean.astype(jnp.float32) * scale
    # Broadcast per-channel -> per (batch*channel) row.  O(N*C) fp32 bytes.
    scale_r = jnp.broadcast_to(scale[None, :], (n, c)).reshape(r, 1)
    shift_r = jnp.broadcast_to(shift[None, :], (n, c)).reshape(r, 1)

    x2 = x.reshape(r, hw)                     # rows = N*C, lane-dense H*W

    tr, thw = _choose_tiles(r, hw, itemsize)
    grid = (pl.cdiv(r, tr), pl.cdiv(hw, thw))

    block_bytes = tr * thw * itemsize
    # Double-buffered input + output blocks (+ tiny scale/shift) + headroom,
    # clamped so it stays well under v7x's 64 MiB physical VMEM.
    vmem_limit = int(min(48 << 20, max(32 << 20, 4 * block_bytes + (4 << 20))))

    out = pl.pallas_call(
        _frozen_bn_kernel,
        out_shape=jax.ShapeDtypeStruct((r, hw), dtype),
        grid=grid,
        in_specs=[
            pl.BlockSpec((tr, thw), lambda i, j: (i, j)),
            pl.BlockSpec((tr, 1), lambda i, j: (i, 0)),
            pl.BlockSpec((tr, 1), lambda i, j: (i, 0)),
        ],
        out_specs=pl.BlockSpec((tr, thw), lambda i, j: (i, j)),
        compiler_params=pltpu.CompilerParams(
            dimension_semantics=("parallel", "parallel"),
            vmem_limit_bytes=vmem_limit),
        input_output_aliases=({0: 0} if donate_input else {}),
    )(x2, scale_r, shift_r)

    return out.reshape(n, c, h, w)


def _reference(x, weight, bias, running_mean, running_var, *, eps=1e-5):
    """Pure-JAX transcription of the PyTorch forward (correctness check)."""
    w = weight.reshape(1, -1, 1, 1)
    b = bias.reshape(1, -1, 1, 1)
    rv = running_var.reshape(1, -1, 1, 1)
    rm = running_mean.reshape(1, -1, 1, 1)
    scale = w * jax.lax.rsqrt(rv + eps)
    shift = b - rm * scale
    return x * scale + shift


if __name__ == "__main__":
    # Small deterministic example: N=2, C=4, H=W=16.
    N, C, H, W = 2, 4, 16, 16

    key = jax.random.PRNGKey(0)
    kx, kw, kb, km, kv = jax.random.split(key, 5)
    x = jax.random.normal(kx, (N, C, H, W), dtype=jnp.float32)
    weight = jax.random.normal(kw, (C,), dtype=jnp.float32)
    bias = jax.random.normal(kb, (C,), dtype=jnp.float32)
    running_mean = jax.random.normal(km, (C,), dtype=jnp.float32)
    running_var = jax.random.uniform(kv, (C,), dtype=jnp.float32,
                                     minval=0.5, maxval=1.5)

    out = frozen_batch_norm_2d(x, weight, bias, running_mean, running_var)
    out = jax.block_until_ready(out)

    ref = _reference(x, weight, bias, running_mean, running_var)

    assert out.shape == (N, C, H, W), out.shape
    assert jnp.allclose(out, ref, rtol=1e-5, atol=1e-5), float(
        jnp.max(jnp.abs(out - ref)))

    print("KERNEL_OK")
</pallas_src>

<mosaic_0001>
module attributes {stable_mosaic.version = 11 : i64} {
  func.func @_frozen_bn_kernel(%arg0: i32, %arg1: i32, %arg2: memref<8x256xf32, #tpu.memory_space<vmem>>, %arg3: memref<8x1xf32, #tpu.memory_space<vmem>>, %arg4: memref<8x1xf32, #tpu.memory_space<vmem>>, %arg5: memref<8x256xf32, #tpu.memory_space<vmem>>) attributes {dimension_semantics = [#tpu.dimension_semantics<parallel>, #tpu.dimension_semantics<parallel>], iteration_bounds = array<i64: 1, 1>, scalar_prefetch = 0 : i64, scratch_operands = 0 : i64, tpu.core_type = #tpu.core_type<tc>, window_params = [{transform_indices = @transform_0, window_bounds = array<i64: 8, 256>}, {transform_indices = @transform_1, window_bounds = array<i64: 8, 1>}, {transform_indices = @transform_2, window_bounds = array<i64: 8, 1>}, {transform_indices = @transform_3, window_bounds = array<i64: 8, 256>}]} {
    %c0 = arith.constant 0 : index
    %c0_0 = arith.constant 0 : index
    %0 = vector.load %arg2[%c0, %c0_0] : memref<8x256xf32, #tpu.memory_space<vmem>>, vector<8x256xf32>
    %c0_1 = arith.constant 0 : index
    %c0_2 = arith.constant 0 : index
    %1 = vector.load %arg3[%c0_1, %c0_2] : memref<8x1xf32, #tpu.memory_space<vmem>>, vector<8x1xf32>
    %2 = vector.broadcast %1 : vector<8x1xf32> to vector<8x256xf32>
    %3 = arith.mulf %0, %2 : vector<8x256xf32>
    %c0_3 = arith.constant 0 : index
    %c0_4 = arith.constant 0 : index
    %4 = vector.load %arg4[%c0_3, %c0_4] : memref<8x1xf32, #tpu.memory_space<vmem>>, vector<8x1xf32>
    %5 = vector.broadcast %4 : vector<8x1xf32> to vector<8x256xf32>
    %6 = arith.addf %3, %5 : vector<8x256xf32>
    %c0_5 = arith.constant 0 : index
    %c0_6 = arith.constant 0 : index
    %7 = vector.load %arg5[%c0_5, %c0_6] : memref<8x256xf32, #tpu.memory_space<vmem>>, vector<8x256xf32>
    tpu.vector_store %arg5[%c0_5, %c0_6], %6 {strides = array<i32>} : memref<8x256xf32, #tpu.memory_space<vmem>>, vector<8x256xf32>,
    return
  }
  func.func @transform_0(%arg0: i32, %arg1: i32) -> (i32, i32) {
    %c0_i32 = arith.constant 0 : i32
    return %arg0, %arg1 : i32, i32
  }
  func.func @transform_1(%arg0: i32, %arg1: i32) -> (i32, i32) {
    %c0_i32 = arith.constant 0 : i32
    %c0_i32_0 = arith.constant 0 : i32
    return %arg0, %c0_i32 : i32, i32
  }
  func.func @transform_2(%arg0: i32, %arg1: i32) -> (i32, i32) {
    %c0_i32 = arith.constant 0 : i32
    %c0_i32_0 = arith.constant 0 : i32
    return %arg0, %c0_i32 : i32, i32
  }
  func.func @transform_3(%arg0: i32, %arg1: i32) -> (i32, i32) {
    %c0_i32 = arith.constant 0 : i32
    return %arg0, %arg1 : i32, i32
  }
}

</mosaic_0001>

<bundles_post_ra>
// kernel: tpu_custom_call.1
= control target key start
LH: loop header
LB: loop body
LE: loop exit
PB: predicated region body
PF: predicated region fallthrough
CT: control target
= control target key end

     0   :  { %s122_s0 = inlined_call_operand.vmem [shape: f32[8,256], index: 0, kind: input, shape index: {}]   ;;  %s123_s1 = inlined_call_operand.vmem [shape: f32[8,1], index: 1, kind: input, shape index: {}]   ;;  %s124_s2 = inlined_call_operand.vmem [shape: f32[8,1], index: 2, kind: input, shape index: {}]   ;;  %s125_s3 = inlined_call_operand.hbm [shape: f32[8,256], index: 3, kind: output, shape index: {}]  }
   0x1   :  { %v17_v0 = vld [vmem:[%s123_s1] sm:$0xff] }
   0x2   :  { %8 = vsyncpa [#allocation3], 0  ;;  %v76_v1 = vmov 0   ;;  %v25_v2 = vld [vmem:[%s124_s2] sm:$0xff]  ;;  %v16_v5 = vld [vmem:[%s122_s0 + $0x8] sm:$0xff]  ;;  %s77_s20 = smov [#allocation2]  }
   0x3   :  { %51 = vset.pattern.permute.xlu0 %v76_v1  ;;  %v15_v4 = vld [vmem:[%s122_s0] sm:$0xff]  ;;  %s41_s1 = sshll.u32 %s77_s20, 4  ;;  %s42_s1 = int_to_ptr.vmem [resolvable:$true] %s41_s1 }
   0x4   :  { %20 = vperm.xlu0 %51, %v17_v0   ;;  %s52_s2 = scalar_lea.vmem %s42_s1, 256  ;;  %p57_p1 = scmp.lt.s32.totalorder %s42_s1, %s42_s1 }
   0x5   :  { %p53_p0 = scmp.ne.s32.totalorder %s42_s1, %s52_s2  ;;  %p58_p2 = scmp.lt.s32.totalorder %s52_s2, %s52_s2 }
   0x7   :  { %p59_p3 = por %p58_p2, %p57_p1 }
   0x8   :  { %28 = vperm.xlu0 %51, %v25_v2  }
   0x9   :  { %p60_p4 = pnand %p59_p3, %p53_p0 }
  0x83   :  { %v21_v3 = vpop.permute.xlu0 %20 }
  0x84   :  { %v23_v6 = vmul.f32 %v21_v3, %v15_v4  ;;  %v24_v7 = vmul.f32 %v21_v3, %v16_v5 }
  0x87   :  { %v29_v8 = vpop.permute.xlu0 %28 }
  0x88   :  { %v31_v9 = vadd.f32 %v29_v8, %v23_v6  ;;  %v32_v10 = vadd.f32 %v29_v8, %v24_v7 }
  0x8a   :  { %33 = vst [vmem:[#allocation2] sm:$0xff] %v31_v9  ;;  %34 = vst [vmem:[#allocation2 + $0x8] sm:$0xff] %v32_v10 }
  0x8b   :  { %63 = shalt.err (!%p60_p4)
}
  0x8c   :  { %s64_s0 = scalar_lea.hbm %s125_s3, 256 }
  0x8d   :  { %p65_p5 = scmp.ne.s32.totalorder %s125_s3, %s64_s0  ;;  %p68_p6 = scmp.lt.u32.totalorder %s64_s0, %s125_s3 }
  0x8f   :  { %p70_p7 = pnand %p68_p6, %p65_p5 }
  0x91   :  { %73 = shalt.err (!%p70_p7)
}
  0x92   :  { %44 = dma.vmem_to_hbm [thread:$0]  %s42_s1, 256, %s125_s3, [#allocation3]  }
  0x93   :  { %74 = dma.done.wait [#allocation3], 256  }
  0x94   :  { %75 = vsyncadd [#allocation3], 4294967040 }
  0x95   :  { %48 = vsyncpa [#allocation3], 1 }

</bundles_post_ra>
